<compile_context>
chip_gen: v6e
topology: v6e:2x2x1
jax: 0.10.0
libtpu: 0.0.40
codegen_flags: <defaults>
</compile_context>

<pallas_src>
import jax
import jax.numpy as jnp
from jax.experimental import pallas as pl
from jax.experimental.pallas import tpu as pltpu


# ----------------------------------------------------------------------------
# In-kernel helper: one cheb_conv, K folded into a single wide spatial matmul.
# ----------------------------------------------------------------------------
def _cheb_apply(t_cat, z, theta_ref):
    """sum_k T_k @ z @ Theta_k  ==  T_cat @ vstack_k(z @ Theta_k).

    t_cat:     (N, K*N)  precomputed [T_0 | T_1 | T_2]
    z:         (N, F_in)
    theta_ref: (K, F_in, F_out) Ref; K is tiny and statically unrolled.
    """
    K = theta_ref.shape[0]
    # Project each k to F_out first (for gc2 this is the small class dim, so
    # the wide spatial matmul runs on the narrow operand), stack vertically.
    b = jnp.concatenate(
        [jnp.dot(z, theta_ref[k], preferred_element_type=jnp.float32)
         for k in range(K)],
        axis=0,
    )                                                               # (K*N, F_out)
    # Single wide spatial contraction; the k-sum happens inside the MXU.
    return jnp.dot(t_cat, b, preferred_element_type=jnp.float32)    # (N, F_out)


# ----------------------------------------------------------------------------
# Fused GCN kernel: gc1 + relu + gc2 + log_softmax, h resident in VMEM/vregs.
# ----------------------------------------------------------------------------
def _gcn_fused_kernel(t_cat_ref, x_ref, th1_ref, th2_ref, o_ref):
    t_cat = t_cat_ref[...]                                 # (N, K*N)
    x = x_ref[...]                                         # (N, F_in)

    # gc1 + relu; the hidden activation never leaves VMEM.
    h = jnp.maximum(_cheb_apply(t_cat, x, th1_ref), 0.0)   # (N, H)

    # F.dropout with training=False is identity (eval-mode forward).
    # TODO(synk): training-mode dropout would use pltpu.prng_seed / prng_random_bits.

    y = _cheb_apply(t_cat, h, th2_ref)                     # (N, C)  (real nclass)

    # log_softmax over dim=1 (class axis).
    m = jnp.max(y, axis=1, keepdims=True)
    z = y - m
    lse = jnp.log(jnp.sum(jnp.exp(z), axis=1, keepdims=True))
    o_ref[...] = z - lse


# ----------------------------------------------------------------------------
# Wrapper.
# ----------------------------------------------------------------------------
def prepare_cheb_cat(cheb_T):
    """(K, N, N) -> (N, K*N) with T_cat[:, k*N:(k+1)*N] == T_k.  Run ONCE at init."""
    K, N, _ = cheb_T.shape
    return jnp.transpose(cheb_T, (1, 0, 2)).reshape(N, K * N)


@jax.jit
def gcn_forward(x, t_cat, theta1, theta2):
    """Fused GCN forward.

    x: (N, F_in), t_cat: (N, K*N), theta1: (K, F_in, H), theta2: (K, H, C).
    """
    N = x.shape[0]
    C = theta2.shape[2]
    vmem = pl.BlockSpec(memory_space=pltpu.MemorySpace.VMEM)

    # Single invocation, no grid: everything fits comfortably in VMEM at these
    # sizes, so no double-buffering / pipeline machinery is emitted.
    # TODO(synk): when N scales (cheb_T/t_cat is K*N^2*4 B): tile the node axis
    # with a grid marked "parallel" (uses both v7x TensorCores), cast the T
    # operand to bf16 for the MXU while keeping f32 accumulation, and set
    # vmem_limit_bytes per generation (v5e default scoped limit 16 MiB,
    # v6e/v7x 32 MiB; v7x physical VMEM is only 64 MiB — leave headroom).
    return pl.pallas_call(
        _gcn_fused_kernel,
        out_shape=jax.ShapeDtypeStruct((N, C), jnp.float32),
        in_specs=[vmem, vmem, vmem, vmem],
        out_specs=vmem,
    )(t_cat, x, theta1, theta2)


# ----------------------------------------------------------------------------
# Setup code (as in cheb_conv.__init__): Chebyshev polynomial stack, init,
# pure-JAX reference for the correctness check.
# ----------------------------------------------------------------------------
def chebyshev_polynomials(adj, K):
    """T_0=I, T_1=L~, T_k = 2 L~ T_{k-1} - T_{k-2}, L~ = 2L/lambda_max - I."""
    N = adj.shape[0]
    deg = jnp.diag(jnp.sum(adj, axis=1))
    L = deg - adj
    lam_max = jnp.max(jnp.linalg.eigvalsh(L))
    L_t = (2.0 / lam_max) * L - jnp.eye(N, dtype=adj.dtype)
    polys = [jnp.eye(N, dtype=adj.dtype), L_t]
    for _ in range(2, K):
        polys.append(2.0 * L_t @ polys[-1] - polys[-2])
    return jnp.stack(polys[:K], axis=0)  # (K, N, N)


def init_theta(key, K, f_in, f_out):
    bound = 1.0 / jnp.sqrt(jnp.float32(f_in))
    return jax.random.uniform(key, (K, f_in, f_out), jnp.float32, -bound, bound)


def gcn_reference(x, cheb_T, theta1, theta2):
    """Pure-JAX reference for correctness check."""
    def cheb(xi, theta):
        return jnp.einsum("knm,mf,kfo->no", cheb_T, xi, theta)
    h = jnp.maximum(cheb(x, theta1), 0.0)
    y = cheb(h, theta2)
    return jax.nn.log_softmax(y, axis=1)


if __name__ == "__main__":
    N_NODES, NFEAT, NHID, NCLASS, CHEB_K = 16, 8, 32, 4, 3

    key = jax.random.PRNGKey(0)
    k_adj, k_x, k_t1, k_t2 = jax.random.split(key, 4)

    # symmetric random adjacency (no self-loops)
    a = (jax.random.uniform(k_adj, (N_NODES, N_NODES)) < 0.3).astype(jnp.float32)
    adj = jnp.maximum(a, a.T) * (1.0 - jnp.eye(N_NODES, dtype=jnp.float32))

    x = jax.random.normal(k_x, (N_NODES, NFEAT), dtype=jnp.float32)

    cheb_T = chebyshev_polynomials(adj, CHEB_K)            # (K, N, N)
    theta1 = init_theta(k_t1, CHEB_K, NFEAT, NHID)         # gc1 weights
    theta2 = init_theta(k_t2, CHEB_K, NHID, NCLASS)        # gc2 weights

    # One-time parameter preprocessing (hoisted out of the per-call hot path).
    t_cat = jax.block_until_ready(prepare_cheb_cat(cheb_T))  # (N, K*N)

    out = jax.block_until_ready(gcn_forward(x, t_cat, theta1, theta2))
    ref = gcn_reference(x, cheb_T, theta1, theta2)

    assert out.shape == (N_NODES, NCLASS)
    assert jnp.allclose(out, ref, atol=1e-4, rtol=1e-4), "mismatch vs reference"
    print("KERNEL_OK")
</pallas_src>

<mosaic_0001>
module attributes {stable_mosaic.version = 11 : i64} {
  func.func @_gcn_fused_kernel(%arg0: memref<16x48xf32, #tpu.memory_space<vmem>>, %arg1: memref<16x8xf32, #tpu.memory_space<vmem>>, %arg2: memref<3x8x32xf32, #tpu.memory_space<vmem>>, %arg3: memref<3x32x4xf32, #tpu.memory_space<vmem>>, %arg4: memref<16x4xf32, #tpu.memory_space<vmem>>) attributes {dimension_semantics = [], scalar_prefetch = 0 : i64, scratch_operands = 0 : i64, tpu.core_type = #tpu.core_type<tc>} {
    %c0 = arith.constant 0 : index
    %c0_0 = arith.constant 0 : index
    %0 = vector.load %arg0[%c0, %c0_0] : memref<16x48xf32, #tpu.memory_space<vmem>>, vector<16x48xf32>
    %c0_1 = arith.constant 0 : index
    %c0_2 = arith.constant 0 : index
    %1 = vector.load %arg1[%c0_1, %c0_2] : memref<16x8xf32, #tpu.memory_space<vmem>>, vector<16x8xf32>
    %c0_3 = arith.constant 0 : index
    %c0_4 = arith.constant 0 : index
    %c0_5 = arith.constant 0 : index
    %2 = vector.load %arg2[%c0_3, %c0_4, %c0_5] : memref<3x8x32xf32, #tpu.memory_space<vmem>>, vector<1x8x32xf32>
    %3 = vector.shape_cast %2 : vector<1x8x32xf32> to vector<8x32xf32>
    %cst = arith.constant dense<0.000000e+00> : vector<16x32xf32>
    %4 = tpu.matmul %1, %3, %cst {dimension_numbers = #tpu.dot_dimension_numbers<[1], [0], [0], [1], [0, 0, 1, 1], [], []>} : vector<16x8xf32>, vector<8x32xf32>, vector<16x32xf32> -> vector<16x32xf32>
    %c1 = arith.constant 1 : index
    %c0_6 = arith.constant 0 : index
    %c0_7 = arith.constant 0 : index
    %5 = vector.load %arg2[%c1, %c0_6, %c0_7] : memref<3x8x32xf32, #tpu.memory_space<vmem>>, vector<1x8x32xf32>
    %6 = vector.shape_cast %5 : vector<1x8x32xf32> to vector<8x32xf32>
    %cst_8 = arith.constant dense<0.000000e+00> : vector<16x32xf32>
    %7 = tpu.matmul %1, %6, %cst_8 {dimension_numbers = #tpu.dot_dimension_numbers<[1], [0], [0], [1], [0, 0, 1, 1], [], []>} : vector<16x8xf32>, vector<8x32xf32>, vector<16x32xf32> -> vector<16x32xf32>
    %c2 = arith.constant 2 : index
    %c0_9 = arith.constant 0 : index
    %c0_10 = arith.constant 0 : index
    %8 = vector.load %arg2[%c2, %c0_9, %c0_10] : memref<3x8x32xf32, #tpu.memory_space<vmem>>, vector<1x8x32xf32>
    %9 = vector.shape_cast %8 : vector<1x8x32xf32> to vector<8x32xf32>
    %cst_11 = arith.constant dense<0.000000e+00> : vector<16x32xf32>
    %10 = tpu.matmul %1, %9, %cst_11 {dimension_numbers = #tpu.dot_dimension_numbers<[1], [0], [0], [1], [0, 0, 1, 1], [], []>} : vector<16x8xf32>, vector<8x32xf32>, vector<16x32xf32> -> vector<16x32xf32>
    %11 = tpu.concatenate %4, %7, %10 in 0 : vector<16x32xf32>, vector<16x32xf32>, vector<16x32xf32> -> vector<48x32xf32>
    %cst_12 = arith.constant dense<0.000000e+00> : vector<16x32xf32>
    %12 = tpu.matmul %0, %11, %cst_12 {dimension_numbers = #tpu.dot_dimension_numbers<[1], [0], [0], [1], [0, 0, 1, 1], [], []>} : vector<16x48xf32>, vector<48x32xf32>, vector<16x32xf32> -> vector<16x32xf32>
    %cst_13 = arith.constant 0.000000e+00 : f32
    %13 = vector.broadcast %cst_13 : f32 to vector<16x32xf32>
    %14 = arith.maximumf %12, %13 : vector<16x32xf32>
    %c0_14 = arith.constant 0 : index
    %c0_15 = arith.constant 0 : index
    %c0_16 = arith.constant 0 : index
    %15 = vector.load %arg3[%c0_14, %c0_15, %c0_16] : memref<3x32x4xf32, #tpu.memory_space<vmem>>, vector<1x32x4xf32>
    %16 = vector.shape_cast %15 : vector<1x32x4xf32> to vector<32x4xf32>
    %cst_17 = arith.constant dense<0.000000e+00> : vector<16x4xf32>
    %17 = tpu.matmul %14, %16, %cst_17 {dimension_numbers = #tpu.dot_dimension_numbers<[1], [0], [0], [1], [0, 0, 1, 1], [], []>} : vector<16x32xf32>, vector<32x4xf32>, vector<16x4xf32> -> vector<16x4xf32>
    %c1_18 = arith.constant 1 : index
    %c0_19 = arith.constant 0 : index
    %c0_20 = arith.constant 0 : index
    %18 = vector.load %arg3[%c1_18, %c0_19, %c0_20] : memref<3x32x4xf32, #tpu.memory_space<vmem>>, vector<1x32x4xf32>
    %19 = vector.shape_cast %18 : vector<1x32x4xf32> to vector<32x4xf32>
    %cst_21 = arith.constant dense<0.000000e+00> : vector<16x4xf32>
    %20 = tpu.matmul %14, %19, %cst_21 {dimension_numbers = #tpu.dot_dimension_numbers<[1], [0], [0], [1], [0, 0, 1, 1], [], []>} : vector<16x32xf32>, vector<32x4xf32>, vector<16x4xf32> -> vector<16x4xf32>
    %c2_22 = arith.constant 2 : index
    %c0_23 = arith.constant 0 : index
    %c0_24 = arith.constant 0 : index
    %21 = vector.load %arg3[%c2_22, %c0_23, %c0_24] : memref<3x32x4xf32, #tpu.memory_space<vmem>>, vector<1x32x4xf32>
    %22 = vector.shape_cast %21 : vector<1x32x4xf32> to vector<32x4xf32>
    %cst_25 = arith.constant dense<0.000000e+00> : vector<16x4xf32>
    %23 = tpu.matmul %14, %22, %cst_25 {dimension_numbers = #tpu.dot_dimension_numbers<[1], [0], [0], [1], [0, 0, 1, 1], [], []>} : vector<16x32xf32>, vector<32x4xf32>, vector<16x4xf32> -> vector<16x4xf32>
    %24 = tpu.concatenate %17, %20, %23 in 0 : vector<16x4xf32>, vector<16x4xf32>, vector<16x4xf32> -> vector<48x4xf32>
    %cst_26 = arith.constant dense<0.000000e+00> : vector<16x4xf32>
    %25 = tpu.matmul %0, %24, %cst_26 {dimension_numbers = #tpu.dot_dimension_numbers<[1], [0], [0], [1], [0, 0, 1, 1], [], []>} : vector<16x48xf32>, vector<48x4xf32>, vector<16x4xf32> -> vector<16x4xf32>
    %cst_27 = arith.constant dense<0xFF800000> : vector<16xf32>
    %26 = vector.multi_reduction <maximumf>, %25, %cst_27 [1] : vector<16x4xf32> to vector<16xf32>
    %27 = vector.shape_cast %26 : vector<16xf32> to vector<16x1xf32>
    %28 = vector.broadcast %27 : vector<16x1xf32> to vector<16x4xf32>
    %29 = arith.subf %25, %28 : vector<16x4xf32>
    %30 = math.exp %29 : vector<16x4xf32>
    %cst_28 = arith.constant dense<0.000000e+00> : vector<16xf32>
    %31 = vector.multi_reduction <add>, %30, %cst_28 [1] : vector<16x4xf32> to vector<16xf32>
    %32 = vector.shape_cast %31 : vector<16xf32> to vector<16x1xf32>
    %33 = math.log %32 : vector<16x1xf32>
    %34 = vector.broadcast %33 : vector<16x1xf32> to vector<16x4xf32>
    %35 = arith.subf %29, %34 : vector<16x4xf32>
    %c0_29 = arith.constant 0 : index
    %c0_30 = arith.constant 0 : index
    %36 = vector.load %arg4[%c0_29, %c0_30] : memref<16x4xf32, #tpu.memory_space<vmem>>, vector<16x4xf32>
    tpu.vector_store %arg4[%c0_29, %c0_30], %35 {strides = array<i32>} : memref<16x4xf32, #tpu.memory_space<vmem>>, vector<16x4xf32>,
    return
  }
}

</mosaic_0001>

<bundles_post_ra>
// kernel: gcn_forward.1
= control target key start
LH: loop header
LB: loop body
LE: loop exit
PB: predicated region body
PF: predicated region fallthrough
CT: control target
= control target key end

     0   :  { %vm22_vm0 = vcmask 64512   ;;  %vm258_vm1 = vcmask 392192   ;;  %vm346_vm2 = vcmask 261120   ;;  %vm663_vm3 = vcmask 31744   ;;  %s967_s2 = inlined_call_operand.vmem [shape: f32[3,8,32], index: 2, kind: input, shape index: {}]   ;;  %s968_s1 = inlined_call_operand.vmem [shape: f32[16,8], index: 1, kind: input, shape index: {}]   ;;  %s969_s0 = inlined_call_operand.vmem [shape: f32[16,48], index: 0, kind: input, shape index: {}]   ;;  %s970_s3 = inlined_call_operand.vmem [shape: f32[3,32,4], index: 3, kind: input, shape index: {}]   ;;  %s971_s4 = inlined_call_operand.vmem [shape: f32[16,4], index: 4, kind: output, shape index: {}]  }
   0x1   :  { %v21_v0 = vld [vmem:[%s967_s2] sm:$0xff]  ;;  %v699_v1 = vld [vmem:[%s967_s2 + $0x10] sm:$0xff]  ;;  %v20_v3 = vld [vmem:[%s968_s1 + $0x8] sm:$0xff] }
   0x2   :  { %v19_v2 = vld [vmem:[%s968_s1] sm:$0xff]  ;;  %763 = vmatprep.subr.mxu1 %v21_v0  ;;  %773 = vmatprep.subr.mxu0 %v699_v1  ;;  %v696_v4 = vld [vmem:[%s967_s2 + $0x8] sm:$0xff]  ;;  %v345_v6 = vld [vmem:[%s970_s3 + $0x18] sm:$0xff] }
   0x3   :  { %764 = vmatpush3.msra.mxu1 %v21_v0  ;;  %765 = vmatprep.mubr.msk.f32.mxu1 %vm22_vm0, %v19_v2  ;;  %v898_v5 = vld [vmem:[%s969_s0] sm:$0xff]  ;;  %v344_v7 = vld [vmem:[%s970_s3 + $0x10] sm:$0xff]  ;;  %v911_v14 = vld [vmem:[%s969_s0 + $0x8] sm:$0xff] }
   0x4   :  { %774 = vmatpush3.msra.mxu0 %v699_v1  ;;  %775 = vmatprep.mubr.msk.f32.mxu0 %vm22_vm0, %v19_v2  ;;  %v715_v15 = vld [vmem:[%s970_s3 + $0x58] sm:$0xff]  ;;  %v714_v16 = vld [vmem:[%s970_s3 + $0x50] sm:$0xff]  ;;  %v343_v17 = vld [vmem:[%s970_s3 + $0x8] sm:$0xff] }
   0x5   :  { %766 = vmatmul.mubr.msk.f32.vlgmr.msra.gmra.mxu1 %vm22_vm0, %v20_v3  ;;  %768 = vmatprep.subr.mxu1 %v696_v4  ;;  %v713_v18 = vld [vmem:[%s970_s3 + $0x48] sm:$0xff]  ;;  %v342_v19 = vld [vmem:[%s970_s3] sm:$0xff]  ;;  %v709_v21 = vld [vmem:[%s970_s3 + $0x38] sm:$0xff] }
   0x6   :  { %776 = vmatmul.mubr.msk.f32.vlgmr.msra.gmra.mxu0 %vm22_vm0, %v20_v3  ;;  %769 = vmatpush3.msra.mxu1 %v696_v4  ;;  %v712_v20 = vld [vmem:[%s970_s3 + $0x40] sm:$0xff]  ;;  %v708_v26 = vld [vmem:[%s970_s3 + $0x30] sm:$0xff]  ;;  %v707_v27 = vld [vmem:[%s970_s3 + $0x28] sm:$0xff] }
   0x7   :  { %770 = vmatprep.mubr.msk.f32.mxu1 %vm22_vm0, %v19_v2  ;;  %793 = vmatprep.subr.mxu0 %v345_v6  ;;  %v706_v28 = vld [vmem:[%s970_s3 + $0x20] sm:$0xff] }
   0x8   :  { %794 = vmatpush3.msra.mxu0 %v345_v6 }
   0x9   :  { %771 = vmatmul.mubr.msk.f32.vlgmr.msra.gmra.mxu1 %vm22_vm0, %v20_v3  ;;  %795 = vmatprep.subr.mxu0 %v344_v7 }
   0xa   :  { %790 = vmatprep.mubr.msk.f32.mxu1 %vm258_vm1, %v898_v5  ;;  %796 = vmatpush3.msra.mxu0 %v344_v7 }
   0xb   :  { %797 = vmatprep.subr.mxu0 %v343_v17 }
   0xc   :  { %798 = vmatpush3.msra.mxu0 %v343_v17 }
   0xd   :  { %799 = vmatprep.subr.mxu0 %v342_v19 }
   0xe   :  { %800 = vmatpush3.msra.mxu0 %v342_v19 }
   0xf   :  { %804 = vmatprep.subr.mxu0 %v709_v21 }
  0xc5   :  { %v767_v8 = vpop.f32.mrf.mxu1 }
  0xc6   :  { %v777_v9 = vpop.f32.mrf.mxu0 }
  0xc7   :  { %778 = vmatprep.subr.mxu1 %v777_v9  ;;  %v95_v10 = vpop.f32.mrf.mxu1 }
  0xc8   :  { %v249_v11 = vpop.f32.mrf.mxu0  ;;  %779 = vmatpush3.msra.mxu1 %v777_v9 }
  0xc9   :  { %780 = vmatprep.subr.mxu1 %v249_v11  ;;  %v772_v12 = vpop.f32.mrf.mxu1 }
  0xca   :  { %781 = vmatpush3.msra.mxu1 %v249_v11 }
  0xcb   :  { %782 = vmatprep.subr.mxu1 %v772_v12  ;;  %v172_v13 = vpop.f32.mrf.mxu1 }
  0xcc   :  { %783 = vmatpush3.msra.mxu1 %v772_v12 }
  0xcd   :  { %784 = vmatprep.subr.mxu1 %v172_v13 }
  0xce   :  { %785 = vmatpush3.msra.mxu1 %v172_v13 }
  0xcf   :  { %786 = vmatprep.subr.mxu1 %v767_v8 }
  0xd0   :  { %787 = vmatpush3.msra.mxu1 %v767_v8 }
  0xd1   :  { %788 = vmatprep.subr.mxu1 %v95_v10 }
  0xd2   :  { %789 = vmatpush3.msra.mxu1 %v95_v10 }
  0xd3   :  { %791 = vmatmul.mubr.msk.f32.vlgmr.msra.gmra.mxu1 %vm258_vm1, %v911_v14  ;;  %815 = vmatprep.subr.mxu1 %v715_v15 }
  0xd4   :  { %816 = vmatpush3.msra.mxu1 %v715_v15 }
  0xd5   :  { %817 = vmatprep.subr.mxu1 %v714_v16 }
  0xd6   :  { %818 = vmatpush3.msra.mxu1 %v714_v16 }
  0xd7   :  { %819 = vmatprep.subr.mxu1 %v713_v18 }
  0xd8   :  { %820 = vmatpush3.msra.mxu1 %v713_v18 }
  0xd9   :  { %821 = vmatprep.subr.mxu1 %v712_v20 }
  0xda   :  { %822 = vmatpush3.msra.mxu1 %v712_v20 }
 0x193   :  { %v792_v22 = vpop.f32.mrf.mxu1 }
 0x194   :  { %v341_v25 = vmax.f32 %v792_v22, 0.0 }
 0x195   :  { %v331_v23 = vpop.f32.mrf.mxu1 }
 0x196   :  { %v340_v24 = vmax.f32 %v331_v23, 0.0 }
 0x198   :  { %801 = vmatprep.mubr.msk.f32.mxu0 %vm346_vm2, %v340_v24  ;;  %823 = vmatprep.mubr.msk.f32.mxu1 %vm346_vm2, %v340_v24 }
 0x199   :  { %802 = vmatmul.mubr.msk.f32.vlgmr.msra.gmra.mxu0 %vm346_vm2, %v341_v25  ;;  %824 = vmatmul.mubr.msk.f32.vlgmr.msra.gmra.mxu1 %vm346_vm2, %v341_v25 }
 0x19a   :  { %805 = vmatpush3.msra.mxu0 %v709_v21  ;;  %812 = vmatprep.mubr.msk.f32.mxu0 %vm346_vm2, %v340_v24 }
 0x19b   :  { %806 = vmatprep.subr.mxu0 %v708_v26 }
 0x19c   :  { %807 = vmatpush3.msra.mxu0 %v708_v26 }
 0x19d   :  { %808 = vmatprep.subr.mxu0 %v707_v27 }
 0x19e   :  { %809 = vmatpush3.msra.mxu0 %v707_v27 }
 0x19f   :  { %810 = vmatprep.subr.mxu0 %v706_v28 }
 0x1a0   :  { %811 = vmatpush3.msra.mxu0 %v706_v28 }
 0x1a1   :  { %813 = vmatmul.mubr.msk.f32.vlgmr.msra.gmra.mxu0 %vm346_vm2, %v341_v25 }
 0x1a2   :  { %838 = vmatprep.mubr.msk.f32.mxu0 %vm258_vm1, %v898_v5 }
 0x259   :  { %v825_v29 = vpop.f32.mrf.mxu1  ;;  %v803_v30 = vpop.f32.mrf.mxu0 }
 0x25a   :  { %826 = vmatprep.subr.mxu0 %v825_v29 }
 0x25b   :  { %v579_v31 = vpop.f32.mrf.mxu1  ;;  %827 = vmatpush3.msra.mxu0 %v825_v29  ;;  %v419_v32 = vpop.f32.mrf.mxu0 }
 0x25c   :  { %828 = vmatprep.subr.mxu0 %v579_v31 }
 0x25d   :  { %829 = vmatpush3.msra.mxu0 %v579_v31 }
 0x261   :  { %v814_v33 = vpop.f32.mrf.mxu0 }
 0x262   :  { %830 = vmatprep.subr.mxu0 %v814_v33 }
 0x263   :  { %v499_v34 = vpop.f32.mrf.mxu0  ;;  %831 = vmatpush3.msra.mxu0 %v814_v33 }
 0x264   :  { %832 = vmatprep.subr.mxu0 %v499_v34 }
 0x265   :  { %833 = vmatpush3.msra.mxu0 %v499_v34 }
 0x266   :  { %834 = vmatprep.subr.mxu0 %v803_v30 }
 0x267   :  { %835 = vmatpush3.msra.mxu0 %v803_v30 }
 0x268   :  { %836 = vmatprep.subr.mxu0 %v419_v32 }
 0x269   :  { %837 = vmatpush3.msra.mxu0 %v419_v32 }
 0x26a   :  { %839 = vmatmul.mubr.msk.f32.vlgmr.msra.gmra.mxu0 %vm258_vm1, %v911_v14 }
 0x32a   :  { %v840_v35 = vpop.f32.mrf.mxu0 }
 0x32b   :  { %v667_v38 = vsel %vm663_vm3, %v840_v35, -inf }
 0x32c   :  { %v654_v36 = vpop.f32.mrf.mxu0 }
 0x32d   :  { %v664_v37 = vsel %vm663_vm3, %v654_v36, -inf }
 0x32e   :  { %665 = vmax.xlane.f32.xlu0 %v664_v37 }
 0x332   :  { %668 = vmax.xlane.f32.xlu0 %v667_v38 }
 0x3b7   :  { %v666_v39 = vpop.xlane.xlu0 %665 }
 0x3b8   :  { %v670_v40 = vsub.f32 %v654_v36, %v666_v39 }
 0x3ba   :  { %v672_v41 = vmul.f32 1.442695, %v670_v40 }
 0x3bb   :  { %v669_v42 = vpop.xlane.xlu0 %668 }
 0x3bc   :  { %841 = vpow2.f32 %v672_v41  ;;  %v671_v43 = vsub.f32 %v840_v35, %v669_v42 }
 0x3be   :  { %v674_v44 = vmul.f32 1.442695, %v671_v43 }
 0x3c0   :  { %843 = vpow2.f32 %v674_v44 }
 0x3c9   :  { %v842_v45 = vpop.eup %841 }
 0x3ca   :  { %v676_v46 = vsel %vm663_vm3, %v842_v45, 0.0 }
 0x3cb   :  { %677 = vadd.xlane.f32.xlu1 %v676_v46 }
 0x3cd   :  { %v844_v47 = vpop.eup %843 }
 0x3ce   :  { %v679_v48 = vsel %vm663_vm3, %v844_v47, 0.0 }
 0x3cf   :  { %680 = vadd.xlane.f32.xlu1 %v679_v48 }
 0x454   :  { %v678_v49 = vpop.xlane.xlu1 %677 }
 0x455   :  { %845 = vlog2.f32 %v678_v49 }
 0x458   :  { %v681_v50 = vpop.xlane.xlu1 %680 }
 0x459   :  { %847 = vlog2.f32 %v681_v50 }
 0x462   :  { %v846_v51 = vpop.eup %845 }
 0x463   :  { %v683_v52 = vmul.f32 0.6931472, %v846_v51 }
 0x465   :  { %v686_v53 = vsub.f32 %v670_v40, %v683_v52 }
 0x466   :  { %v848_v54 = vpop.eup %847 }
 0x467   :  { %688 = vst.msk [vmem:[%s971_s4] sm:$0xff] %vm663_vm3, %v686_v53  ;;  %v685_v55 = vmul.f32 0.6931472, %v848_v54 }
 0x469   :  { %v687_v56 = vsub.f32 %v671_v43, %v685_v55 }
 0x46b   :  { %689 = vst.msk [vmem:[%s971_s4 + $0x8] sm:$0xff] %vm663_vm3, %v687_v56 }

</bundles_post_ra>
